<compile_context>
chip_gen: v7x
topology: tpu7x:2x2x1
jax: 0.10.0
libtpu: 0.0.40
codegen_flags: <defaults>
</compile_context>

<pallas_src>
import functools

import jax
import jax.numpy as jnp
from jax.experimental import pallas as pl
from jax.experimental.pallas import tpu as pltpu


LANE = 128  # lane width: pad the logits dim to this for dense stores


def _round_up(n, m):
    return ((n + m - 1) // m) * m


def _mlp_kernel(x_ref, w1_ref, b1_ref, w2_ref, b2_ref, w3_ref, b3_ref, o_ref):
    """One batch tile of the fused 3-layer MLP: relu(relu(x@W1+b1)@W2+b2)@W3+b3."""
    x = x_ref[...]
    # bf16 operands into the MXU, f32 accumulate; bias add + ReLU stay f32 (VPU).
    h1 = jnp.dot(x.astype(w1_ref.dtype), w1_ref[...],
                 preferred_element_type=jnp.float32) + b1_ref[...]
    h1 = jnp.maximum(h1, 0.0)
    h2 = jnp.dot(h1.astype(w2_ref.dtype), w2_ref[...],
                 preferred_element_type=jnp.float32) + b2_ref[...]
    h2 = jnp.maximum(h2, 0.0)
    logits = jnp.dot(h2.astype(w3_ref.dtype), w3_ref[...],
                     preferred_element_type=jnp.float32) + b3_ref[...]
    o_ref[...] = logits.astype(o_ref.dtype)   # lane-dense (TB, 128) store


@functools.partial(jax.jit, static_argnames=("act_size", "block_b"))
def categorical_policy_forward(x, w1, b1, w2, b2, w3, b3, *, act_size, block_b=256):
    """Pallas wrapper. x: [B, ob_size] -> logits: [B, act_size].

    w3/b3 are expected lane-padded to LANE (=128) output columns.
    """
    B, ob_size = x.shape
    hidden = w1.shape[1]
    n_pad = w3.shape[1]                     # lane-padded logits width (128)

    # Batch tile: multiple of 8 sublanes, capped at block_b; pad B up to a
    # multiple of the tile so every grid step sees a full (TB, *) block.
    tb = min(block_b, _round_up(B, 8))
    b_pad = _round_up(B, tb)
    if b_pad != B:
        x = jnp.pad(x, ((0, b_pad - B), (0, 0)))

    grid = (b_pad // tb,)

    # Constant index map -> operand loaded once and pinned in VMEM for the grid.
    def pinned(a):
        return pl.BlockSpec(a.shape, lambda i: (0,) * a.ndim)

    flops = 2 * b_pad * (ob_size * hidden + hidden * hidden + hidden * n_pad)
    bytes_accessed = (
        b_pad * ob_size * x.dtype.itemsize
        + sum(int(a.size) * a.dtype.itemsize for a in (w1, b1, w2, b2, w3, b3))
        + b_pad * n_pad * 4
    )

    out = pl.pallas_call(
        _mlp_kernel,
        out_shape=jax.ShapeDtypeStruct((b_pad, n_pad), jnp.float32),
        grid=grid,
        in_specs=[
            pl.BlockSpec((tb, ob_size), lambda i: (i, 0)),   # streamed per tile
            pinned(w1), pinned(b1),
            pinned(w2), pinned(b2),
            pinned(w3), pinned(b3),
        ],
        out_specs=pl.BlockSpec((tb, n_pad), lambda i: (i, 0)),
        compiler_params=pltpu.CompilerParams(
            dimension_semantics=("parallel",)),                # v7x: 2 TCs
        cost_estimate=pl.CostEstimate(
            flops=flops, transcendentals=0, bytes_accessed=bytes_accessed),
    )(x, w1, b1, w2, b2, w3, b3)

    return out[:B, :act_size]


def ppo_forward_discrete(x, params, act_size, block_b=256):
    """PPO.forward, discrete branch: argmax(softmax(logits)) == argmax(logits).

    Quant/DeQuant stubs are identity in un-prepared eager mode, so forward
    reduces to the policy logits + argmax.
    """
    # TODO(synk): torch.ao.quantization Quant/DeQuantStub (int8 observer path) has
    # no clean Pallas equivalent (v7x MXU is fp8-only, no int8); treated as identity.
    logits = categorical_policy_forward(x, *params, act_size=act_size, block_b=block_b)
    return jnp.argmax(logits, axis=-1)


def init_params(key, ob_size, act_size, layer_size):
    """Init mirroring nn.Linear's U(-1/sqrt(fan_in), 1/sqrt(fan_in)).

    Weights are created in (in_features, out_features) layout and stored in
    bfloat16; biases stay f32. The last layer is zero-padded to LANE output
    columns for lane-dense stores.
    """
    ks = jax.random.split(key, 6)

    def lin(kw, kb, fan_in, fan_out, pad_out=None):
        bound = 1.0 / jnp.sqrt(jnp.float32(fan_in))
        w = jax.random.uniform(kw, (fan_in, fan_out), jnp.float32, -bound, bound)
        b = jax.random.uniform(kb, (1, fan_out), jnp.float32, -bound, bound)
        if pad_out is not None and pad_out > fan_out:
            w = jnp.pad(w, ((0, 0), (0, pad_out - fan_out)))
            b = jnp.pad(b, ((0, 0), (0, pad_out - fan_out)))
        return w.astype(jnp.bfloat16), b    # bf16 weights, f32 biases

    w1, b1 = lin(ks[0], ks[1], ob_size, layer_size)
    w2, b2 = lin(ks[2], ks[3], layer_size, layer_size)
    w3, b3 = lin(ks[4], ks[5], layer_size, act_size, pad_out=LANE)
    return w1, b1, w2, b2, w3, b3


def reference_forward(x, w1, b1, w2, b2, w3, b3, act_size):
    """Plain-JAX reference of the exact same math (bf16 operands, f32 accumulate)."""
    h1 = jnp.maximum(jnp.dot(x.astype(jnp.bfloat16), w1,
                             preferred_element_type=jnp.float32) + b1, 0.0)
    h2 = jnp.maximum(jnp.dot(h1.astype(jnp.bfloat16), w2,
                             preferred_element_type=jnp.float32) + b2, 0.0)
    out = jnp.dot(h2.astype(jnp.bfloat16), w3,
                  preferred_element_type=jnp.float32) + b3
    return out[:, :act_size]


if __name__ == "__main__":
    # CategoricalPolicy(ob_size, act_size) with hidden width layer_size (the
    # PyTorch snippet omits layer_size in the ctor call; fixed to 64 here).
    ob_size, act_size, layer_size = 16, 6, 64
    batch = 200          # exercises batch tiling + row padding with block_b=64

    key = jax.random.PRNGKey(0)
    kx, kp = jax.random.split(key)
    x = jax.random.normal(kx, (batch, ob_size), jnp.float32)
    params = init_params(kp, ob_size, act_size, layer_size)

    logits = categorical_policy_forward(x, *params, act_size=act_size, block_b=64)
    logits = jax.block_until_ready(logits)

    ref = reference_forward(x, *params, act_size=act_size)
    assert logits.shape == (batch, act_size)
    assert jnp.allclose(logits, ref, atol=1e-3, rtol=1e-3), "mismatch vs reference"

    # PPO.forward discrete path: argmax over logits (softmax is monotone).
    actions = ppo_forward_discrete(x, params, act_size, block_b=64)
    actions = jax.block_until_ready(actions)
    assert actions.shape == (batch,)
    assert bool(jnp.all(actions == jnp.argmax(ref, axis=-1)))

    print("KERNEL_OK")
</pallas_src>

<mosaic_0001>
module attributes {stable_mosaic.version = 11 : i64} {
  func.func @_mlp_kernel(%arg0: i32, %arg1: memref<64x16xf32, #tpu.memory_space<vmem>>, %arg2: memref<16x64xbf16, #tpu.memory_space<vmem>>, %arg3: memref<1x64xf32, #tpu.memory_space<vmem>>, %arg4: memref<64x64xbf16, #tpu.memory_space<vmem>>, %arg5: memref<1x64xf32, #tpu.memory_space<vmem>>, %arg6: memref<64x128xbf16, #tpu.memory_space<vmem>>, %arg7: memref<1x128xf32, #tpu.memory_space<vmem>>, %arg8: memref<64x128xf32, #tpu.memory_space<vmem>>) attributes {dimension_semantics = [#tpu.dimension_semantics<parallel>], iteration_bounds = array<i64: 4>, scalar_prefetch = 0 : i64, scratch_operands = 0 : i64, tpu.core_type = #tpu.core_type<tc>, window_params = [{transform_indices = @transform_0, window_bounds = array<i64: 64, 16>}, {pipeline_mode = #tpu.pipeline_mode<synchronous>, transform_indices = @transform_1, window_bounds = array<i64: 16, 64>}, {pipeline_mode = #tpu.pipeline_mode<synchronous>, transform_indices = @transform_2, window_bounds = array<i64: 1, 64>}, {pipeline_mode = #tpu.pipeline_mode<synchronous>, transform_indices = @transform_3, window_bounds = array<i64: 64, 64>}, {pipeline_mode = #tpu.pipeline_mode<synchronous>, transform_indices = @transform_4, window_bounds = array<i64: 1, 64>}, {pipeline_mode = #tpu.pipeline_mode<synchronous>, transform_indices = @transform_5, window_bounds = array<i64: 64, 128>}, {pipeline_mode = #tpu.pipeline_mode<synchronous>, transform_indices = @transform_6, window_bounds = array<i64: 1, 128>}, {transform_indices = @transform_7, window_bounds = array<i64: 64, 128>}]} {
    %c0 = arith.constant 0 : index
    %c0_0 = arith.constant 0 : index
    %0 = vector.load %arg1[%c0, %c0_0] : memref<64x16xf32, #tpu.memory_space<vmem>>, vector<64x16xf32>
    %1 = arith.truncf %0 : vector<64x16xf32> to vector<64x16xbf16>
    %c0_1 = arith.constant 0 : index
    %c0_2 = arith.constant 0 : index
    %2 = vector.load %arg2[%c0_1, %c0_2] : memref<16x64xbf16, #tpu.memory_space<vmem>>, vector<16x64xbf16>
    %cst = arith.constant dense<0.000000e+00> : vector<64x64xf32>
    %3 = tpu.matmul %1, %2, %cst {dimension_numbers = #tpu.dot_dimension_numbers<[1], [0], [0], [1], [0, 0, 1, 1], [], []>} : vector<64x16xbf16>, vector<16x64xbf16>, vector<64x64xf32> -> vector<64x64xf32>
    %c0_3 = arith.constant 0 : index
    %c0_4 = arith.constant 0 : index
    %4 = vector.load %arg3[%c0_3, %c0_4] : memref<1x64xf32, #tpu.memory_space<vmem>>, vector<1x64xf32>
    %5 = vector.broadcast %4 : vector<1x64xf32> to vector<64x64xf32>
    %6 = arith.addf %3, %5 : vector<64x64xf32>
    %cst_5 = arith.constant 0.000000e+00 : f32
    %7 = vector.broadcast %cst_5 : f32 to vector<64x64xf32>
    %8 = arith.maximumf %6, %7 : vector<64x64xf32>
    %9 = arith.truncf %8 : vector<64x64xf32> to vector<64x64xbf16>
    %c0_6 = arith.constant 0 : index
    %c0_7 = arith.constant 0 : index
    %10 = vector.load %arg4[%c0_6, %c0_7] : memref<64x64xbf16, #tpu.memory_space<vmem>>, vector<64x64xbf16>
    %cst_8 = arith.constant dense<0.000000e+00> : vector<64x64xf32>
    %11 = tpu.matmul %9, %10, %cst_8 {dimension_numbers = #tpu.dot_dimension_numbers<[1], [0], [0], [1], [0, 0, 1, 1], [], []>} : vector<64x64xbf16>, vector<64x64xbf16>, vector<64x64xf32> -> vector<64x64xf32>
    %c0_9 = arith.constant 0 : index
    %c0_10 = arith.constant 0 : index
    %12 = vector.load %arg5[%c0_9, %c0_10] : memref<1x64xf32, #tpu.memory_space<vmem>>, vector<1x64xf32>
    %13 = vector.broadcast %12 : vector<1x64xf32> to vector<64x64xf32>
    %14 = arith.addf %11, %13 : vector<64x64xf32>
    %cst_11 = arith.constant 0.000000e+00 : f32
    %15 = vector.broadcast %cst_11 : f32 to vector<64x64xf32>
    %16 = arith.maximumf %14, %15 : vector<64x64xf32>
    %17 = arith.truncf %16 : vector<64x64xf32> to vector<64x64xbf16>
    %c0_12 = arith.constant 0 : index
    %c0_13 = arith.constant 0 : index
    %18 = vector.load %arg6[%c0_12, %c0_13] : memref<64x128xbf16, #tpu.memory_space<vmem>>, vector<64x128xbf16>
    %cst_14 = arith.constant dense<0.000000e+00> : vector<64x128xf32>
    %19 = tpu.matmul %17, %18, %cst_14 {dimension_numbers = #tpu.dot_dimension_numbers<[1], [0], [0], [1], [0, 0, 1, 1], [], []>} : vector<64x64xbf16>, vector<64x128xbf16>, vector<64x128xf32> -> vector<64x128xf32>
    %c0_15 = arith.constant 0 : index
    %c0_16 = arith.constant 0 : index
    %20 = vector.load %arg7[%c0_15, %c0_16] : memref<1x128xf32, #tpu.memory_space<vmem>>, vector<1x128xf32>
    %21 = vector.broadcast %20 : vector<1x128xf32> to vector<64x128xf32>
    %22 = arith.addf %19, %21 : vector<64x128xf32>
    %c0_17 = arith.constant 0 : index
    %c0_18 = arith.constant 0 : index
    %23 = vector.load %arg8[%c0_17, %c0_18] : memref<64x128xf32, #tpu.memory_space<vmem>>, vector<64x128xf32>
    tpu.vector_store %arg8[%c0_17, %c0_18], %22 {strides = array<i32>} : memref<64x128xf32, #tpu.memory_space<vmem>>, vector<64x128xf32>,
    return
  }
  func.func @transform_0(%arg0: i32) -> (i32, i32) {
    %c0_i32 = arith.constant 0 : i32
    %c0_i32_0 = arith.constant 0 : i32
    return %arg0, %c0_i32 : i32, i32
  }
  func.func @transform_1(%arg0: i32) -> (i32, i32) {
    %c0_i32 = arith.constant 0 : i32
    %c0_i32_0 = arith.constant 0 : i32
    %c0_i32_1 = arith.constant 0 : i32
    return %c0_i32, %c0_i32_0 : i32, i32
  }
  func.func @transform_2(%arg0: i32) -> (i32, i32) {
    %c0_i32 = arith.constant 0 : i32
    %c0_i32_0 = arith.constant 0 : i32
    %c0_i32_1 = arith.constant 0 : i32
    return %c0_i32, %c0_i32_0 : i32, i32
  }
  func.func @transform_3(%arg0: i32) -> (i32, i32) {
    %c0_i32 = arith.constant 0 : i32
    %c0_i32_0 = arith.constant 0 : i32
    %c0_i32_1 = arith.constant 0 : i32
    return %c0_i32, %c0_i32_0 : i32, i32
  }
  func.func @transform_4(%arg0: i32) -> (i32, i32) {
    %c0_i32 = arith.constant 0 : i32
    %c0_i32_0 = arith.constant 0 : i32
    %c0_i32_1 = arith.constant 0 : i32
    return %c0_i32, %c0_i32_0 : i32, i32
  }
  func.func @transform_5(%arg0: i32) -> (i32, i32) {
    %c0_i32 = arith.constant 0 : i32
    %c0_i32_0 = arith.constant 0 : i32
    %c0_i32_1 = arith.constant 0 : i32
    return %c0_i32, %c0_i32_0 : i32, i32
  }
  func.func @transform_6(%arg0: i32) -> (i32, i32) {
    %c0_i32 = arith.constant 0 : i32
    %c0_i32_0 = arith.constant 0 : i32
    %c0_i32_1 = arith.constant 0 : i32
    return %c0_i32, %c0_i32_0 : i32, i32
  }
  func.func @transform_7(%arg0: i32) -> (i32, i32) {
    %c0_i32 = arith.constant 0 : i32
    %c0_i32_0 = arith.constant 0 : i32
    return %arg0, %c0_i32 : i32, i32
  }
}

</mosaic_0001>

<bundles_post_ra>
// kernel: categorical_policy_forward.1
= control target key start
LH: loop header
LB: loop body
LE: loop exit
PB: predicated region body
PF: predicated region fallthrough
CT: control target
= control target key end

     0   :  { %s872_s24 = smov 0   ;;  %s940_s0 = inlined_call_operand.vmem [shape: f32[256,16], index: 0, kind: input, shape index: {}]   ;;  %s941_s1 = inlined_call_operand.vmem [shape: bf16[16,64], index: 1, kind: input, shape index: {}]   ;;  %s942_s2 = inlined_call_operand.vmem [shape: f32[1,64], index: 2, kind: input, shape index: {}]   ;;  %s943_s3 = inlined_call_operand.vmem [shape: bf16[64,64], index: 3, kind: input, shape index: {}]   ;;  %s944_s4 = inlined_call_operand.vmem [shape: f32[1,64], index: 4, kind: input, shape index: {}]   ;;  %s945_s5 = inlined_call_operand.vmem [shape: bf16[64,128], index: 5, kind: input, shape index: {}]   ;;  %s946_s6 = inlined_call_operand.vmem [shape: f32[1,128], index: 6, kind: input, shape index: {}]   ;;  %s947_s7 = inlined_call_operand.vmem [shape: f32[256,128], index: 7, kind: output, shape index: {}]  }
   0x1 LB: > { %s709_s25 = sadd.s32 4294967295, %s830_s24   ;;  %p713_p0 = scmp.ge.s32.totalorder %s830_s24, 1  ;;  %s830_s24 = sphi %s872_s24, %s17_s24  }
   0x2   : > { %p238_p1 = scmp.lt.s32.totalorder %s830_s24, 5 }
   0x4   : > { %p239_p2 = pnand %p713_p0, %p238_p1 }
   0x5   : > { %v815_v0 = vld [vmem:[%s941_s1] sm:$0xff] (!%p239_p2)   ;;  %s714_s28 = sshll.u32 (!%p239_p2), %s709_s25, 3  ;;  %v817_v2 = vld [vmem:[%s943_s3 + $0x8] sm:$0xff] (!%p239_p2)   ;;  %vm310_vm0 = vcmask (!%p239_p2), 130048   ;;  %v818_v15 = vld [vmem:[%s943_s3 + $0x10] sm:$0xff] (!%p239_p2)   ;;  %vm439_vm1 = vcmask (!%p239_p2), 523264  }
   0x6   : > { %242 = sbr.rel (%p239_p2) target bundleno = 690 (0x2b2), region = 48  ;;  %p271_p3 = scmp.lt.s32.totalorder (!%p239_p2), %s714_s28, 31  ;;  %765 = vmatprep.subr.bf16.mxu0 (!%p239_p2), %v815_v0  ;;  %v816_v1 = vld [vmem:[%s943_s3] sm:$0xff] (!%p239_p2)   ;;  %v819_v16 = vld [vmem:[%s943_s3 + $0x18] sm:$0xff] (!%p239_p2)   ;;  %v821_v18 = vld [vmem:[%s945_s5 + $0x8] sm:$0xff] (!%p239_p2)  }
   0x7   : > { %766 = vmatpush3.bf16.msra.mxu0 (!%p239_p2), %v815_v0  ;;  %775 = vmatprep.subr.bf16.mxu1 (!%p239_p2), %v816_v1  ;;  %v820_v17 = vld [vmem:[%s945_s5] sm:$0xff] (!%p239_p2)   ;;  %v822_v48 = vld [vmem:[%s945_s5 + $0x10] sm:$0xff] (!%p239_p2)   ;;  %v823_v49 = vld [vmem:[%s945_s5 + $0x18] sm:$0xff] (!%p239_p2)  }
   0x8   : > { %776 = vmatpush3.bf16.msra.mxu1 (!%p239_p2), %v816_v1  ;;  %791 = vmatprep.subr.bf16.mxu0 (!%p239_p2), %v820_v17  ;;  %v718_v19 = vld [vmem:[%s942_s2] ss:$0 sm:$0xff] (!%p239_p2) }
   0x9   : > { %777 = vmatprep.subr.bf16.mxu1 (!%p239_p2), %v817_v2  ;;  %v724_v50 = vld [vmem:[%s944_s4] ss:$0 sm:$0xff] (!%p239_p2) }
   0xc   : > { %778 = vmatpush3.bf16.msra.mxu1 (!%p239_p2), %v817_v2 }
   0xd   : > { %s949_s28 = smov (!%p271_p3, %s714_s28), 31  ;;  %779 = vmatprep.subr.bf16.mxu1 %v818_v15 }
   0xe   : > { %s715_s10 = sshll.u32 %s949_s28, 3 }
   0xf   : > { %s274_s13 = scalar_lea.vmem %s940_s0, %s715_s10  ;;  %s280_s14 = scalar_lea.vmem %s947_s7, %s715_s10 }
  0x10   : > { %v283_v3 = vld [vmem:[%s274_s13] sm:$0xff]  ;;  %v284_v4 = vld [vmem:[%s274_s13 + $0x8] sm:$0xff]  ;;  %v285_v5 = vld [vmem:[%s274_s13 + $0x10] sm:$0xff]  ;;  %780 = vmatpush3.bf16.msra.mxu1 %v818_v15 }
  0x11   : > { %v291_v6 = vpack.c.bf16 %v284_v4, %v283_v3  ;;  %v286_v7 = vld [vmem:[%s274_s13 + $0x18] sm:$0xff]  ;;  %v287_v8 = vld [vmem:[%s274_s13 + $0x20] sm:$0xff]  ;;  %v288_v9 = vld [vmem:[%s274_s13 + $0x28] sm:$0xff]  ;;  %781 = vmatprep.subr.bf16.mxu1 %v819_v16 }
  0x12   : > { %v292_v10 = vpack.c.bf16 %v286_v7, %v285_v5  ;;  %v293_v11 = vpack.c.bf16 %v288_v9, %v287_v8  ;;  %v289_v12 = vld [vmem:[%s274_s13 + $0x30] sm:$0xff]  ;;  %v290_v13 = vld [vmem:[%s274_s13 + $0x38] sm:$0xff]  ;;  %v733_v15 = vld [vmem:[%s946_s6] ss:$0 sm:$0xff] }
  0x13   : > { %767 = vmatprep.mubr.msk.bf16.mxu0 %vm310_vm0, %v291_v6  ;;  %v294_v14 = vpack.c.bf16 %v290_v13, %v289_v12 }
  0x14   : > { %768 = vmatmul.mubr.msk.bf16.vlgmr.msra.gmra.mrb[0].mxu0 %vm310_vm0, %v292_v10  ;;  %782 = vmatpush3.bf16.msra.mxu1 %v819_v16 }
  0x15   : > { %771 = vmatprep.mubr.msk.bf16.mxu0 %vm310_vm0, %v293_v11  ;;  %792 = vmatpush3.bf16.msra.mxu0 %v820_v17 }
  0x16   : > { %793 = vmatprep.subr.bf16.mxu0 %v821_v18 }
  0x19   : > { %794 = vmatpush3.bf16.msra.mxu0 %v821_v18 }
  0x1a   : > { %795 = vmatprep.subr.bf16.mxu0 %v822_v48 }
  0x1c   : > { %772 = vmatmul.mubr.msk.bf16.gmra.mrb[4].mxu0 %vm310_vm0, %v294_v14 }
  0x1d   : > { %796 = vmatpush3.bf16.msra.mxu0 %v822_v48 }
  0x1e   : > { %797 = vmatprep.subr.bf16.mxu0 %v823_v49 }
  0x21   : > { %798 = vmatpush3.bf16.msra.mxu0 %v823_v49 }
  0xe7   : > { %v769_v20 = vpop.f32.mrb[0].mxu0 }
  0xe8   : > { %v366_v21 = vadd.f32 %v769_v20, %v718_v19  ;;  %v357_v22 = vpop.f32.mrb[1].mxu0 }
  0xe9   : > { %v358_v23 = vadd.f32 %v718_v19, %v357_v22  ;;  %v770_v24 = vpop.f32.mrb[2].mxu0 }
  0xea   : > { %v369_v25 = vadd.f32 %v770_v24, %v718_v19  ;;  %v360_v26 = vpop.f32.mrb[3].mxu0  ;;  %v390_v28 = vmax.f32 %v366_v21, 0.0 }
  0xeb   : > { %v361_v27 = vadd.f32 %v718_v19, %v360_v26  ;;  %v388_v30 = vmax.f32 %v358_v23, 0.0 }
  0xec   : > { %v391_v29 = vmax.f32 %v369_v25, 0.0 }
  0xed   : > { %v389_v31 = vmax.f32 %v361_v27, 0.0 }
  0xee   : > { %v397_v32 = vpack.c.bf16 %v391_v29, %v390_v28 }
  0xef   : > { %v773_v33 = vpop.f32.mrb[4].mxu0  ;;  %v396_v34 = vpack.c.bf16 %v389_v31, %v388_v30 }
  0xf0   : > { %v382_v35 = vadd.f32 %v773_v33, %v718_v19  ;;  %v373_v36 = vpop.f32.mrb[5].mxu0 }
  0xf1   : > { %v374_v37 = vadd.f32 %v718_v19, %v373_v36  ;;  %v774_v38 = vpop.f32.mrb[6].mxu0  ;;  %783 = vmatprep.mubr.msk.bf16.mxu1 %vm439_vm1, %v396_v34 }
  0xf2   : > { %v385_v39 = vadd.f32 %v774_v38, %v718_v19  ;;  %v376_v40 = vpop.f32.mrb[7].mxu0  ;;  %784 = vmatmul.mubr.msk.bf16.vlgmr.msra.gmra.mrb[0].mxu1 %vm439_vm1, %v397_v32  ;;  %v394_v42 = vmax.f32 %v382_v35, 0.0 }
  0xf3   : > { %v377_v41 = vadd.f32 %v718_v19, %v376_v40  ;;  %v392_v44 = vmax.f32 %v374_v37, 0.0 }
  0xf4   : > { %v395_v43 = vmax.f32 %v385_v39, 0.0 }
  0xf5   : > { %v393_v45 = vmax.f32 %v377_v41, 0.0 }
  0xf6   : > { %v399_v46 = vpack.c.bf16 %v395_v43, %v394_v42 }
  0xf7   : > { %v398_v47 = vpack.c.bf16 %v393_v45, %v392_v44 }
  0xf9   : > { %787 = vmatprep.mubr.msk.bf16.mxu1 %vm439_vm1, %v398_v47 }
  0xfa   : > { %788 = vmatmul.mubr.msk.bf16.gmra.mrb[4].mxu1 %vm439_vm1, %v399_v46 }
 0x1c5   : > { %v785_v51 = vpop.f32.mrb[0].mxu1 }
 0x1c6   : > { %v495_v52 = vadd.f32 %v785_v51, %v724_v50  ;;  %v486_v53 = vpop.f32.mrb[1].mxu1 }
 0x1c7   : > { %v487_v54 = vadd.f32 %v724_v50, %v486_v53  ;;  %v786_v55 = vpop.f32.mrb[2].mxu1 }
 0x1c8   : > { %v498_v56 = vadd.f32 %v786_v55, %v724_v50  ;;  %v489_v57 = vpop.f32.mrb[3].mxu1  ;;  %v519_v59 = vmax.f32 %v495_v52, 0.0 }
 0x1c9   : > { %v490_v58 = vadd.f32 %v724_v50, %v489_v57  ;;  %v517_v61 = vmax.f32 %v487_v54, 0.0 }
 0x1ca   : > { %v520_v60 = vmax.f32 %v498_v56, 0.0 }
 0x1cb   : > { %v518_v62 = vmax.f32 %v490_v58, 0.0 }
 0x1cc   : > { %v526_v63 = vpack.c.bf16 %v520_v60, %v519_v59 }
 0x1cd   : > { %v525_v0 = vpack.c.bf16 %v518_v62, %v517_v61  ;;  %v789_v1 = vpop.f32.mrb[4].mxu1 }
 0x1ce   : > { %v511_v2 = vadd.f32 %v789_v1, %v724_v50  ;;  %v502_v3 = vpop.f32.mrb[5].mxu1 }
 0x1cf   : > { %v503_v4 = vadd.f32 %v724_v50, %v502_v3  ;;  %v790_v5 = vpop.f32.mrb[6].mxu1  ;;  %799 = vmatprep.mubr.msk.bf16.mxu0 %vm439_vm1, %v525_v0 }
 0x1d0   : > { %v514_v6 = vadd.f32 %v790_v5, %v724_v50  ;;  %v505_v7 = vpop.f32.mrb[7].mxu1  ;;  %800 = vmatmul.mubr.msk.bf16.vlgmr.msra.gmra.mrb[8].mxu0 %vm439_vm1, %v526_v63  ;;  %v523_v9 = vmax.f32 %v511_v2, 0.0 }
 0x1d1   : > { %v506_v8 = vadd.f32 %v724_v50, %v505_v7  ;;  %v521_v11 = vmax.f32 %v503_v4, 0.0 }
 0x1d2   : > { %v524_v10 = vmax.f32 %v514_v6, 0.0 }
 0x1d3   : > { %v522_v12 = vmax.f32 %v506_v8, 0.0 }
 0x1d4   : > { %v528_v13 = vpack.c.bf16 %v524_v10, %v523_v9 }
 0x1d5   : > { %v527_v14 = vpack.c.bf16 %v522_v12, %v521_v11 }
 0x1d7   : > { %803 = vmatprep.mubr.msk.bf16.mxu0 %vm439_vm1, %v527_v14 }
 0x1d8   : > { %804 = vmatmul.mubr.msk.bf16.gmra.mrb[12].mxu0 %vm439_vm1, %v528_v13 }
 0x2a3   : > { %v801_v16 = vpop.f32.mrb[8].mxu0 }
 0x2a4   : > { %v623_v17 = vadd.f32 %v801_v16, %v733_v15  ;;  %v614_v18 = vpop.f32.mrb[9].mxu0 }
 0x2a5   : > { %v615_v19 = vadd.f32 %v733_v15, %v614_v18  ;;  %v802_v20 = vpop.f32.mrb[10].mxu0 }
 0x2a6   : > { %647 = vst [vmem:[%s280_s14 + $0x10] sm:$0xff] %v623_v17  ;;  %v626_v21 = vadd.f32 %v802_v20, %v733_v15  ;;  %v617_v22 = vpop.f32.mrb[11].mxu0 }
 0x2a7   : > { %645 = vst [vmem:[%s280_s14] sm:$0xff] %v615_v19  ;;  %v618_v23 = vadd.f32 %v733_v15, %v617_v22 }
 0x2a8   : > { %648 = vst [vmem:[%s280_s14 + $0x18] sm:$0xff] %v626_v21 }
 0x2a9   : > { %646 = vst [vmem:[%s280_s14 + $0x8] sm:$0xff] %v618_v23 }
 0x2ab   : > { %v805_v24 = vpop.f32.mrb[12].mxu0 }
 0x2ac   : > { %v639_v25 = vadd.f32 %v805_v24, %v733_v15  ;;  %v630_v26 = vpop.f32.mrb[13].mxu0 }
 0x2ad   : > { %v631_v27 = vadd.f32 %v733_v15, %v630_v26  ;;  %v806_v28 = vpop.f32.mrb[14].mxu0 }
 0x2ae   : > { %651 = vst [vmem:[%s280_s14 + $0x30] sm:$0xff] %v639_v25  ;;  %v642_v29 = vadd.f32 %v806_v28, %v733_v15  ;;  %v633_v30 = vpop.f32.mrb[15].mxu0 }
 0x2af   : > { %649 = vst [vmem:[%s280_s14 + $0x20] sm:$0xff] %v631_v27  ;;  %v634_v31 = vadd.f32 %v733_v15, %v633_v30 }
 0x2b0   : > { %652 = vst [vmem:[%s280_s14 + $0x38] sm:$0xff] %v642_v29 }
 0x2b1   : > { %650 = vst [vmem:[%s280_s14 + $0x28] sm:$0xff] %v634_v31 }
 0x2b2 PF: > { %s17_s24 = sadd.s32 1, %s830_s24  }
 0x2b3   : > { %p14_p4 = scmp.ge.s32.totalorder %s17_s24, 6  }
 0x2b5   :  { %16 = sbr.rel (!%p14_p4) target bundleno = 1 (0x1), region = 78 }

</bundles_post_ra>
